<compile_context>
chip_gen: v7x
topology: tpu7x:2x2x1
jax: 0.10.0
libtpu: 0.0.40
codegen_flags: <defaults>
</compile_context>

<pallas_src>
import jax
import jax.numpy as jnp
from jax.experimental import pallas as pl
from jax.experimental.pallas import tpu as pltpu


def mlp_kernel(x_ref, w1_ref, b1_ref, w2_ref, b2_ref, w3_ref, b3_ref, out_ref):
    x = x_ref[...]          # (TILE_B, 3)  f32
    w1 = w1_ref[...]        # (3, 128)     f32

    # fc1 + ReLU: K=3 contraction as broadcast FMAs on the VPU
    # (a K=3 matmul fills <3% of the MXU systolic array).
    h1 = (x[:, 0:1] * w1[0:1, :]
          + x[:, 1:2] * w1[1:2, :]
          + x[:, 2:3] * w1[2:3, :]
          + b1_ref[...])
    h1 = jnp.maximum(h1, 0.0)                                   # (TILE_B, 128) f32

    # fc2 + ReLU on the MXU (K=128), bf16 operands, f32 accumulate.
    h2 = jnp.dot(h1.astype(w2_ref.dtype), w2_ref[...],
                 preferred_element_type=jnp.float32)
    h2 = jnp.maximum(h2 + b2_ref[...], 0.0)                     # (TILE_B, 64) f32

    # fc3 on the MXU (K=64), bf16 operands, f32 accumulate; store only the
    # 2 real output columns (lane-masked stores, 64x less HBM writeback).
    out = jnp.dot(h2.astype(w3_ref.dtype), w3_ref[...],
                  preferred_element_type=jnp.float32)
    out_ref[...] = (out + b3_ref[...]).astype(out_ref.dtype)    # (TILE_B, 2)


def _round_up(n, m):
    return ((n + m - 1) // m) * m


def prepare_params(w1, b1, w2, b2, w3, b3):
    """One-time weight prep (hoisted out of the per-call wrapper):
    fc2/fc3 weights -> bfloat16 for the MXU; everything else stays f32."""
    return (w1.astype(jnp.float32), b1.astype(jnp.float32),
            w2.astype(jnp.bfloat16), b2.astype(jnp.float32),
            w3.astype(jnp.bfloat16), b3.astype(jnp.float32))


def mlp_forward(x, params, tile_b=2048):
    """x: (B, 3) f32; params from prepare_params(). Returns (B, 2) f32."""
    w1, b1, w2, b2, w3, b3 = params
    B = x.shape[0]
    out_dim = w3.shape[1]
    hid1 = w1.shape[1]
    hid2 = w2.shape[1]

    # Batch tile: large to amortize the ~0.35us per-grid-step overhead, but
    # capped at tile_b (<= 4096 keeps the per-step footprint well under the
    # v7x 32 MiB scoped-VMEM default).  Prefer >= 2 grid steps when the batch
    # allows it so the "parallel" axis can shard across both v7x TensorCores.
    b8 = _round_up(B, 8)
    tb = min(tile_b, b8)
    if tb == b8 and b8 >= 16:
        tb = _round_up(pl.cdiv(b8, 2), 8)
    Bp = _round_up(B, tb)
    if Bp != B:
        x = jnp.pad(x, ((0, Bp - B), (0, 0)))

    grid = (Bp // tb,)

    out = pl.pallas_call(
        mlp_kernel,
        out_shape=jax.ShapeDtypeStruct((Bp, out_dim), jnp.float32),
        grid_spec=pltpu.PrefetchScalarGridSpec(
            num_scalar_prefetch=0,
            grid=grid,
            in_specs=[
                # x: tiled over batch, double-buffered by the pipeline.
                pl.BlockSpec((tb, 3), lambda i: (i, 0)),
                # weights / biases: same block every step -> VMEM-resident.
                pl.BlockSpec((3, hid1), lambda i: (0, 0)),
                pl.BlockSpec((1, hid1), lambda i: (0, 0)),
                pl.BlockSpec((hid1, hid2), lambda i: (0, 0)),
                pl.BlockSpec((1, hid2), lambda i: (0, 0)),
                pl.BlockSpec((hid2, out_dim), lambda i: (0, 0)),
                pl.BlockSpec((1, out_dim), lambda i: (0, 0)),
            ],
            # (tb, 2): last dim equals the full array dim -> legal block; the
            # writeback is one contiguous tb*8 B DMA per step.
            out_specs=pl.BlockSpec((tb, out_dim), lambda i: (i, 0)),
        ),
        compiler_params=pltpu.CompilerParams(
            dimension_semantics=("parallel",),
        ),
    )(x, w1, b1, w2, b2, w3, b3)

    return out[:B]


def init_linear(key, fan_in, fan_out):
    # PyTorch default init: U(-1/sqrt(fan_in), 1/sqrt(fan_in)) for weight & bias.
    kw, kb = jax.random.split(key)
    bound = 1.0 / jnp.sqrt(fan_in)
    w = jax.random.uniform(kw, (fan_in, fan_out), jnp.float32, -bound, bound)
    b = jax.random.uniform(kb, (1, fan_out), jnp.float32, -bound, bound)
    return w, b


if __name__ == "__main__":
    key = jax.random.PRNGKey(0)
    k_x, k1, k2, k3 = jax.random.split(key, 4)

    B = 8  # small demo batch (kernel itself tiles/pipelines arbitrary B)
    x = jax.random.normal(k_x, (B, 3), jnp.float32)

    w1, b1 = init_linear(k1, 3, 128)
    w2, b2 = init_linear(k2, 128, 64)
    w3, b3 = init_linear(k3, 64, 2)

    params = prepare_params(w1, b1, w2, b2, w3, b3)  # one-time bf16 weight prep
    out = mlp_forward(x, params)
    jax.block_until_ready(out)

    # Pure-JAX f32 reference (highest precision); kernel uses bf16 MXU operands,
    # so compare with a correspondingly loosened tolerance.
    hp = jax.lax.Precision.HIGHEST
    ref = jnp.maximum(jnp.dot(x, w1, precision=hp) + b1, 0.0)
    ref = jnp.maximum(jnp.dot(ref, w2, precision=hp) + b2, 0.0)
    ref = jnp.dot(ref, w3, precision=hp) + b3

    assert out.shape == (B, 2)
    assert jnp.allclose(out, ref, rtol=2e-2, atol=2e-2), "mismatch vs reference"

    print("KERNEL_OK")
</pallas_src>

<mosaic_0001>
module attributes {stable_mosaic.version = 11 : i64} {
  func.func @mlp_kernel(%arg0: i32, %arg1: memref<8x3xf32, #tpu.memory_space<vmem>>, %arg2: memref<3x128xf32, #tpu.memory_space<vmem>>, %arg3: memref<1x128xf32, #tpu.memory_space<vmem>>, %arg4: memref<128x64xbf16, #tpu.memory_space<vmem>>, %arg5: memref<1x64xf32, #tpu.memory_space<vmem>>, %arg6: memref<64x2xbf16, #tpu.memory_space<vmem>>, %arg7: memref<1x2xf32, #tpu.memory_space<vmem>>, %arg8: memref<8x2xf32, #tpu.memory_space<vmem>>) attributes {dimension_semantics = [#tpu.dimension_semantics<parallel>], iteration_bounds = array<i64: 1>, scalar_prefetch = 0 : i64, scratch_operands = 0 : i64, tpu.core_type = #tpu.core_type<tc>, window_params = [{transform_indices = @transform_0, window_bounds = array<i64: 8, 3>}, {pipeline_mode = #tpu.pipeline_mode<synchronous>, transform_indices = @transform_1, window_bounds = array<i64: 3, 128>}, {pipeline_mode = #tpu.pipeline_mode<synchronous>, transform_indices = @transform_2, window_bounds = array<i64: 1, 128>}, {pipeline_mode = #tpu.pipeline_mode<synchronous>, transform_indices = @transform_3, window_bounds = array<i64: 128, 64>}, {pipeline_mode = #tpu.pipeline_mode<synchronous>, transform_indices = @transform_4, window_bounds = array<i64: 1, 64>}, {pipeline_mode = #tpu.pipeline_mode<synchronous>, transform_indices = @transform_5, window_bounds = array<i64: 64, 2>}, {pipeline_mode = #tpu.pipeline_mode<synchronous>, transform_indices = @transform_6, window_bounds = array<i64: 1, 2>}, {transform_indices = @transform_7, window_bounds = array<i64: 8, 2>}]} {
    %c0 = arith.constant 0 : index
    %c0_0 = arith.constant 0 : index
    %0 = vector.load %arg1[%c0, %c0_0] : memref<8x3xf32, #tpu.memory_space<vmem>>, vector<8x3xf32>
    %c0_1 = arith.constant 0 : index
    %c0_2 = arith.constant 0 : index
    %1 = vector.load %arg2[%c0_1, %c0_2] : memref<3x128xf32, #tpu.memory_space<vmem>>, vector<3x128xf32>
    %2 = vector.extract_strided_slice %0 {offsets = [0, 0], sizes = [8, 1], strides = [1, 1]} : vector<8x3xf32> to vector<8x1xf32>
    %3 = vector.extract_strided_slice %1 {offsets = [0, 0], sizes = [1, 128], strides = [1, 1]} : vector<3x128xf32> to vector<1x128xf32>
    %4 = vector.broadcast %2 : vector<8x1xf32> to vector<8x128xf32>
    %5 = vector.broadcast %3 : vector<1x128xf32> to vector<8x128xf32>
    %6 = arith.mulf %4, %5 : vector<8x128xf32>
    %7 = vector.extract_strided_slice %0 {offsets = [0, 1], sizes = [8, 1], strides = [1, 1]} : vector<8x3xf32> to vector<8x1xf32>
    %8 = vector.extract_strided_slice %1 {offsets = [1, 0], sizes = [1, 128], strides = [1, 1]} : vector<3x128xf32> to vector<1x128xf32>
    %9 = vector.broadcast %7 : vector<8x1xf32> to vector<8x128xf32>
    %10 = vector.broadcast %8 : vector<1x128xf32> to vector<8x128xf32>
    %11 = arith.mulf %9, %10 : vector<8x128xf32>
    %12 = arith.addf %6, %11 : vector<8x128xf32>
    %13 = vector.extract_strided_slice %0 {offsets = [0, 2], sizes = [8, 1], strides = [1, 1]} : vector<8x3xf32> to vector<8x1xf32>
    %14 = vector.extract_strided_slice %1 {offsets = [2, 0], sizes = [1, 128], strides = [1, 1]} : vector<3x128xf32> to vector<1x128xf32>
    %15 = vector.broadcast %13 : vector<8x1xf32> to vector<8x128xf32>
    %16 = vector.broadcast %14 : vector<1x128xf32> to vector<8x128xf32>
    %17 = arith.mulf %15, %16 : vector<8x128xf32>
    %18 = arith.addf %12, %17 : vector<8x128xf32>
    %c0_3 = arith.constant 0 : index
    %c0_4 = arith.constant 0 : index
    %19 = vector.load %arg3[%c0_3, %c0_4] : memref<1x128xf32, #tpu.memory_space<vmem>>, vector<1x128xf32>
    %20 = vector.broadcast %19 : vector<1x128xf32> to vector<8x128xf32>
    %21 = arith.addf %18, %20 : vector<8x128xf32>
    %cst = arith.constant 0.000000e+00 : f32
    %22 = vector.broadcast %cst : f32 to vector<8x128xf32>
    %23 = arith.maximumf %21, %22 : vector<8x128xf32>
    %24 = arith.truncf %23 : vector<8x128xf32> to vector<8x128xbf16>
    %c0_5 = arith.constant 0 : index
    %c0_6 = arith.constant 0 : index
    %25 = vector.load %arg4[%c0_5, %c0_6] : memref<128x64xbf16, #tpu.memory_space<vmem>>, vector<128x64xbf16>
    %cst_7 = arith.constant dense<0.000000e+00> : vector<8x64xf32>
    %26 = tpu.matmul %24, %25, %cst_7 {dimension_numbers = #tpu.dot_dimension_numbers<[1], [0], [0], [1], [0, 0, 1, 1], [], []>} : vector<8x128xbf16>, vector<128x64xbf16>, vector<8x64xf32> -> vector<8x64xf32>
    %c0_8 = arith.constant 0 : index
    %c0_9 = arith.constant 0 : index
    %27 = vector.load %arg5[%c0_8, %c0_9] : memref<1x64xf32, #tpu.memory_space<vmem>>, vector<1x64xf32>
    %28 = vector.broadcast %27 : vector<1x64xf32> to vector<8x64xf32>
    %29 = arith.addf %26, %28 : vector<8x64xf32>
    %cst_10 = arith.constant 0.000000e+00 : f32
    %30 = vector.broadcast %cst_10 : f32 to vector<8x64xf32>
    %31 = arith.maximumf %29, %30 : vector<8x64xf32>
    %32 = arith.truncf %31 : vector<8x64xf32> to vector<8x64xbf16>
    %c0_11 = arith.constant 0 : index
    %c0_12 = arith.constant 0 : index
    %33 = vector.load %arg6[%c0_11, %c0_12] : memref<64x2xbf16, #tpu.memory_space<vmem>>, vector<64x2xbf16>
    %cst_13 = arith.constant dense<0.000000e+00> : vector<8x2xf32>
    %34 = tpu.matmul %32, %33, %cst_13 {dimension_numbers = #tpu.dot_dimension_numbers<[1], [0], [0], [1], [0, 0, 1, 1], [], []>} : vector<8x64xbf16>, vector<64x2xbf16>, vector<8x2xf32> -> vector<8x2xf32>
    %c0_14 = arith.constant 0 : index
    %c0_15 = arith.constant 0 : index
    %35 = vector.load %arg7[%c0_14, %c0_15] : memref<1x2xf32, #tpu.memory_space<vmem>>, vector<1x2xf32>
    %36 = vector.broadcast %35 : vector<1x2xf32> to vector<8x2xf32>
    %37 = arith.addf %34, %36 : vector<8x2xf32>
    %c0_16 = arith.constant 0 : index
    %c0_17 = arith.constant 0 : index
    %38 = vector.load %arg8[%c0_16, %c0_17] : memref<8x2xf32, #tpu.memory_space<vmem>>, vector<8x2xf32>
    tpu.vector_store %arg8[%c0_16, %c0_17], %37 {strides = array<i32>} : memref<8x2xf32, #tpu.memory_space<vmem>>, vector<8x2xf32>,
    return
  }
  func.func @transform_0(%arg0: i32) -> (i32, i32) {
    %c0_i32 = arith.constant 0 : i32
    %c0_i32_0 = arith.constant 0 : i32
    return %arg0, %c0_i32 : i32, i32
  }
  func.func @transform_1(%arg0: i32) -> (i32, i32) {
    %c0_i32 = arith.constant 0 : i32
    %c0_i32_0 = arith.constant 0 : i32
    %c0_i32_1 = arith.constant 0 : i32
    return %c0_i32, %c0_i32_0 : i32, i32
  }
  func.func @transform_2(%arg0: i32) -> (i32, i32) {
    %c0_i32 = arith.constant 0 : i32
    %c0_i32_0 = arith.constant 0 : i32
    %c0_i32_1 = arith.constant 0 : i32
    return %c0_i32, %c0_i32_0 : i32, i32
  }
  func.func @transform_3(%arg0: i32) -> (i32, i32) {
    %c0_i32 = arith.constant 0 : i32
    %c0_i32_0 = arith.constant 0 : i32
    %c0_i32_1 = arith.constant 0 : i32
    return %c0_i32, %c0_i32_0 : i32, i32
  }
  func.func @transform_4(%arg0: i32) -> (i32, i32) {
    %c0_i32 = arith.constant 0 : i32
    %c0_i32_0 = arith.constant 0 : i32
    %c0_i32_1 = arith.constant 0 : i32
    return %c0_i32, %c0_i32_0 : i32, i32
  }
  func.func @transform_5(%arg0: i32) -> (i32, i32) {
    %c0_i32 = arith.constant 0 : i32
    %c0_i32_0 = arith.constant 0 : i32
    %c0_i32_1 = arith.constant 0 : i32
    return %c0_i32, %c0_i32_0 : i32, i32
  }
  func.func @transform_6(%arg0: i32) -> (i32, i32) {
    %c0_i32 = arith.constant 0 : i32
    %c0_i32_0 = arith.constant 0 : i32
    %c0_i32_1 = arith.constant 0 : i32
    return %c0_i32, %c0_i32_0 : i32, i32
  }
  func.func @transform_7(%arg0: i32) -> (i32, i32) {
    %c0_i32 = arith.constant 0 : i32
    %c0_i32_0 = arith.constant 0 : i32
    return %arg0, %c0_i32 : i32, i32
  }
}

</mosaic_0001>

<bundles_post_ra>
// kernel: tpu_custom_call.1
= control target key start
LH: loop header
LB: loop body
LE: loop exit
PB: predicated region body
PF: predicated region fallthrough
CT: control target
= control target key end

     0   :  { %v354_v0 = vmov 0   ;;  %v355_v2 = vmov 2   ;;  %v356_v4 = vmov 0.0   ;;  %v357_v6 = vmov 1   ;;  %s467_s0 = inlined_call_operand.vmem [shape: f32[8,3], index: 0, kind: input, shape index: {}]   ;;  %s468_s3 = inlined_call_operand.vmem [shape: bf16[128,64], index: 3, kind: input, shape index: {}]   ;;  %s469_s5 = inlined_call_operand.vmem [shape: bf16[64,2], index: 5, kind: input, shape index: {}]   ;;  %s470_s1 = inlined_call_operand.vmem [shape: f32[3,128], index: 1, kind: input, shape index: {}]   ;;  %s471_s2 = inlined_call_operand.vmem [shape: f32[1,128], index: 2, kind: input, shape index: {}]   ;;  %s472_s4 = inlined_call_operand.vmem [shape: f32[1,64], index: 4, kind: input, shape index: {}]   ;;  %s473_s6 = inlined_call_operand.vmem [shape: f32[1,2], index: 6, kind: input, shape index: {}]   ;;  %s474_s7 = inlined_call_operand.vmem [shape: f32[8,2], index: 7, kind: output, shape index: {}]  }
   0x1   :  { %338 = vset.pattern.permute.xlu0 %v354_v0  ;;  %v27_v1 = vld [vmem:[%s467_s0] sm:$0xff]  ;;  %340 = vset.pattern.permute.xlu1 %v355_v2  ;;  %v343_v5 = vld [vmem:[%s468_s3 + $0x8] sm:$0xff]   ;;  %v344_v7 = vld [vmem:[%s468_s3 + $0x10] sm:$0xff]   ;;  %vm358_vm0 = vmmov 0   ;;  %v34_v15 = vlaneseq  ;;  %vm221_vm1 = vcmask 523264   ;;  %vm265_vm2 = vcmask 15360  }
   0x2   :  { %31 = vperm.xlu0 %338, %v27_v1   ;;  %50 = vperm.xlu1 %340, %v27_v1   ;;  %v342_v3 = vld [vmem:[%s468_s3] sm:$0xff]   ;;  %v345_v8 = vld [vmem:[%s468_s3 + $0x18] sm:$0xff]   ;;  %v347_v10 = vld [vmem:[%s468_s3 + $0x28] sm:$0xff]  }
   0x3   :  { %301 = vmatprep.subr.bf16.mxu0 %v356_v4  ;;  %321 = vmatprep.subr.bf16.mxu1 %v356_v4  ;;  %v346_v9 = vld [vmem:[%s468_s3 + $0x20] sm:$0xff]   ;;  %v351_v12 = vld [vmem:[%s469_s5 + $0x8] sm:$0xff]   ;;  %v348_v13 = vld [vmem:[%s468_s3 + $0x30] sm:$0xff]   ;;  %v35_v16 = vshrl.u32 %v34_v15, 7 }
   0x4   :  { %302 = vmatpush3.bf16.msra.mxu0 %v342_v3  ;;  %317 = vmatprep.mubr.msk.bf16.mxu0 %vm358_vm0, %v356_v4  ;;  %v350_v11 = vld [vmem:[%s469_s5] sm:$0xff]   ;;  %v349_v14 = vld [vmem:[%s468_s3 + $0x38] sm:$0xff]   ;;  %v352_v36 = vld [vmem:[%s469_s5 + $0x10] sm:$0xff]  }
   0x5   :  { %303 = vmatprep.subr.bf16.mxu0 %v356_v4  ;;  %329 = vmatprep.mubr.msk.bf16.mxu1 %vm358_vm0, %v356_v4  ;;  %v36_v17 = vsub.s32 0, %v35_v16  ;;  %v45_v18 = vsub.s32 1, %v35_v16  ;;  %v55_v19 = vsub.s32 2, %v35_v16  ;;  %v28_v20 = vld [vmem:[%s470_s1] sm:$0x7]  ;;  %v353_v37 = vld [vmem:[%s469_s5 + $0x18] sm:$0xff]  }
   0x6   :  { %339 = vset.pattern.permute.xlu0 %v357_v6  ;;  %322 = vmatpush3.bf16.msra.mxu1 %v350_v11  ;;  %v271_v31 = vld [vmem:[%s471_s2] ss:$0 sm:$0xff] }
   0x7   :  { %40 = vperm.xlu0 %339, %v27_v1   ;;  %323 = vmatprep.subr.bf16.mxu1 %v356_v4  ;;  %v37_v22 = vrot.slane %v28_v20, %v36_v17  ;;  %v46_v23 = vrot.slane %v28_v20, %v45_v18  ;;  %v56_v24 = vrot.slane %v28_v20, %v55_v19  ;;  %v272_v38 = vld [vmem:[%s472_s4] ss:$0 sm:$0xff] }
   0x8   :  { %304 = vmatpush3.bf16.msra.mxu0 %v343_v5  ;;  %v281_v46 = vld [vmem:[%s473_s6] ss:$0 sm:$0xff] }
   0x9   :  { %305 = vmatprep.subr.bf16.mxu0 %v356_v4 }
   0xa   :  { %324 = vmatpush3.bf16.msra.mxu1 %v351_v12 }
   0xb   :  { %341 = vset.pattern.permute.xlu0 %v355_v2  ;;  %325 = vmatprep.subr.bf16.mxu1 %v356_v4 }
   0xc   :  { %306 = vmatpush3.bf16.msra.mxu0 %v344_v7 }
   0xd   :  { %307 = vmatprep.subr.bf16.mxu0 %v356_v4 }
   0xe   :  { %326 = vmatpush3.bf16.msra.mxu1 %v352_v36 }
   0xf   :  { %327 = vmatprep.subr.bf16.mxu1 %v356_v4 }
  0x10   :  { %308 = vmatpush3.bf16.msra.mxu0 %v345_v8 }
  0x11   :  { %309 = vmatprep.subr.bf16.mxu0 %v356_v4 }
  0x12   :  { %328 = vmatpush3.bf16.msra.mxu1 %v353_v37 }
  0x14   :  { %310 = vmatpush3.bf16.msra.mxu0 %v346_v9 }
  0x15   :  { %311 = vmatprep.subr.bf16.mxu0 %v356_v4 }
  0x18   :  { %312 = vmatpush3.bf16.msra.mxu0 %v347_v10 }
  0x19   :  { %313 = vmatprep.subr.bf16.mxu0 %v356_v4 }
  0x1c   :  { %314 = vmatpush3.bf16.msra.mxu0 %v348_v13 }
  0x1d   :  { %315 = vmatprep.subr.bf16.mxu0 %v356_v4 }
  0x20   :  { %316 = vmatpush3.bf16.msra.mxu0 %v349_v14 }
  0x81   :  { %v32_v21 = vpop.permute.xlu0 %31  ;;  %v51_v25 = vpop.permute.xlu1 %50 }
  0x82   :  { %v38_v27 = vmul.f32 %v37_v22, %v32_v21  ;;  %v57_v29 = vmul.f32 %v56_v24, %v51_v25 }
  0x86   :  { %v41_v26 = vpop.permute.xlu0 %40 }
  0x87   :  { %v47_v28 = vmul.f32 %v46_v23, %v41_v26 }
  0x89   :  { %v48_v30 = vadd.f32 %v47_v28, %v38_v27 }
  0x8b   :  { %v58_v32 = vadd.f32 %v57_v29, %v48_v30 }
  0x8d   :  { %v66_v33 = vadd.f32 %v271_v31, %v58_v32 }
  0x8f   :  { %v67_v34 = vmax.f32 %v66_v33, 0.0 }
  0x91   :  { %v68_v35 = vpack.c.bf16 %v67_v34, %v67_v34 }
  0x93   :  { %318 = vmatmul.mubr.bf16.vlgmr.msra.gmra.mrb[0].mxu0 %v68_v35 }
 0x166   :  { %v174_v39 = vpop.f32.mrb[0].mxu0 }
 0x167   :  { %v175_v40 = vadd.f32 %v272_v38, %v174_v39  ;;  %v319_v41 = vpop.f32.mrb[1].mxu0 }
 0x168   :  { %v177_v42 = vpop.f32.mrb[2].mxu0 }
 0x169   :  { %v180_v43 = vmax.f32 %v175_v40, 0.0  ;;  %v320_v44 = vpop.f32.mrb[3].mxu0 }
 0x16b   :  { %v181_v45 = vpack.c.bf16 %v180_v43, %v180_v43 }
 0x16d   :  { %330 = vmatmul.mubr.msk.bf16.vlgmr.msra.gmra.mrb[0].mxu1 %vm221_vm1, %v181_v45 }
 0x240   :  { %v259_v47 = vpop.f32.mrb[0].mxu1 }
 0x241   :  { %v260_v48 = vadd.f32 %v281_v46, %v259_v47  ;;  %v331_v49 = vpop.f32.mrb[1].mxu1 }
 0x242   :  { %v262_v50 = vpop.f32.mrb[2].mxu1 }
 0x243   :  { %266 = vst.msk [vmem:[%s474_s7] sm:$0xff] %vm265_vm2, %v260_v48  ;;  %v332_v51 = vpop.f32.mrb[3].mxu1 }

</bundles_post_ra>
